<compile_context>
chip_gen: v7x
topology: tpu7x:2x2x1
jax: 0.10.0
libtpu: 0.0.40
codegen_flags: <defaults>
</compile_context>

<pallas_src>
import jax
import jax.numpy as jnp
from jax.experimental import pallas as pl
from jax.experimental.pallas import tpu as pltpu


# --------------------------------------------------------------------------
# Fused kernel: one grid step == one diffusion timestep.
#   q_sample prologue + single matmul over all (pre-sliced, concatenated)
#   decoder-block channels + fused bias (incl. temb projection) + SiLU.
# --------------------------------------------------------------------------
def _fused_step_kernel(coefs_ref, z_ref, noise_ref, wT_ref, bias_ref, o_ref):
    # coefs_ref : (num_steps, 2)  SMEM   (sqrt_acp[t], sqrt(1 - acp[t]))
    # z_ref     : (Cin, HW)       VMEM   clean latent, channels-first (lane = HW)
    # noise_ref : (1, Cin, HW)    VMEM   per-step gaussian noise
    # wT_ref    : (Csum, Cin)     VMEM   concatenated channel-pre-sliced W^T
    # bias_ref  : (1, Csum, 1)    VMEM   per-step fused bias (b + temb @ wt)
    # o_ref     : (1, Csum, HW)   VMEM   per-step activations, lane-dense
    s = pl.program_id(0)
    a = coefs_ref[s, 0]
    b = coefs_ref[s, 1]

    # q_sample, fused elementwise prologue
    x = a * z_ref[...] + b * noise_ref[0]                              # (Cin, HW)

    # one MXU matmul for all blocks' kept channels at once
    h = jnp.dot(wT_ref[...], x, preferred_element_type=jnp.float32)    # (Csum, HW)
    h = h + bias_ref[0]                                                # bcast over HW
    o_ref[0] = h * jax.nn.sigmoid(h)                                   # SiLU


def fused_feature_steps(coefs, z_c_hw, noise, wT, bias):
    """coefs: (S, 2); z_c_hw: (Cin, HW); noise: (S, Cin, HW);
       wT: (Csum, Cin); bias: (S, Csum, 1)  ->  (S, Csum, HW)."""
    num_steps, Cin, HW = noise.shape
    Csum = wT.shape[0]
    return pl.pallas_call(
        _fused_step_kernel,
        out_shape=jax.ShapeDtypeStruct((num_steps, Csum, HW), jnp.float32),
        grid=(num_steps,),
        in_specs=[
            pl.BlockSpec(memory_space=pltpu.MemorySpace.SMEM),      # coefs table
            pl.BlockSpec((Cin, HW), lambda s: (0, 0)),              # z (constant)
            pl.BlockSpec((1, Cin, HW), lambda s: (s, 0, 0)),        # per-step noise
            pl.BlockSpec((Csum, Cin), lambda s: (0, 0)),            # W^T (constant)
            pl.BlockSpec((1, Csum, 1), lambda s: (s, 0, 0)),        # per-step bias
        ],
        out_specs=pl.BlockSpec((1, Csum, HW), lambda s: (s, 0, 0)),
        compiler_params=pltpu.CompilerParams(
            dimension_semantics=("parallel",)),                     # v7x: 2 TCs
    )(coefs, z_c_hw, noise, wT, bias)


# --------------------------------------------------------------------------
# Glue: sinusoidal timestep embedding (setup, plain JAX)
# --------------------------------------------------------------------------
def timestep_embedding(t, dim):
    half = dim // 2
    freqs = jnp.exp(-jnp.log(10000.0) * jnp.arange(half, dtype=jnp.float32) / half)
    args = jnp.float32(t) * freqs
    return jnp.concatenate([jnp.cos(args), jnp.sin(args)], axis=-1)  # (dim,)


# --------------------------------------------------------------------------
# FeatureExtractorDDPM analog
# --------------------------------------------------------------------------
class FeatureExtractorDDPMPallas:
    def __init__(self, blocks, steps, key, *, latent_ch=4, spatial=16,
                 t_emb_dim=128, block_channels=(32, 16), num_train_steps=100):
        self.blocks = list(blocks)
        self.steps = list(steps)
        self.latent_ch = latent_ch
        self.spatial = spatial
        self.t_emb_dim = t_emb_dim

        # DDPM linear beta schedule (as in q_sample of the pretrained model).
        betas = jnp.linspace(1e-4, 0.02, num_train_steps, dtype=jnp.float32)
        acp = jnp.cumprod(1.0 - betas)
        self.sqrt_acp = jnp.sqrt(acp)
        self.sqrt_1m_acp = jnp.sqrt(1.0 - acp)

        # Deterministic synthetic params per selected block.  The channel slice
        # [0:-1:2] is applied HERE (only sliced channels are ever returned, so
        # the kernel never computes/stores the discarded half), and all blocks'
        # sliced weights are concatenated along Cout for one matmul per step.
        w_cols, b_cols, wt_cols = [], [], []
        self.block_couts = []
        k = key
        for idx in self.blocks:
            cout = block_channels[idx % len(block_channels)]
            k, kw, kb, kt = jax.random.split(k, 4)
            w = 0.1 * jax.random.normal(kw, (latent_ch, cout), dtype=jnp.float32)
            b = 0.01 * jax.random.normal(kb, (1, cout), dtype=jnp.float32)
            wt = 0.05 * jax.random.normal(kt, (t_emb_dim, cout), dtype=jnp.float32)
            w_s, b_s, wt_s = w[:, 0:-1:2], b[:, 0:-1:2], wt[:, 0:-1:2]
            w_cols.append(w_s)
            b_cols.append(b_s)
            wt_cols.append(wt_s)
            self.block_couts.append(w_s.shape[1])

        w_all = jnp.concatenate(w_cols, axis=1)            # (Cin, Csum)
        self.wT_all = w_all.T                              # (Csum, Cin)
        self.b_all = jnp.concatenate(b_cols, axis=1)       # (1, Csum)
        self.wt_all = jnp.concatenate(wt_cols, axis=1)     # (Demb, Csum)
        self.Csum = self.wT_all.shape[0]

        self._noise_key = jax.random.fold_in(key, 1234)

        # TODO(synk): the pretrained ControlNet (`control_model`) output is computed
        # in the original forward but never consumed (control=None downstream); skipped.
        # TODO(synk): cross-attention with the text context and the VAE encode
        # (get_input / cv2 preprocessing) have no clean synthetic Pallas equivalent;
        # the latent z is provided directly.

    def forward(self, z_nchw):
        """z_nchw: (1, C, H, W) float32 latent. Returns list of NCHW activations,
        one per (step, block), channel-sliced with [:, 0:-1:2, :, :]."""
        N, C, H, W = z_nchw.shape
        assert N == 1 and C == self.latent_ch and H == self.spatial and W == self.spatial
        HW = H * W
        num_steps = len(self.steps)
        z_c_hw = z_nchw.reshape(C, HW)                      # channels-first, lane = HW

        # Per-step q_sample coefficient table -> SMEM.
        t_arr = jnp.asarray(self.steps, dtype=jnp.int32)
        coefs = jnp.stack([self.sqrt_acp[t_arr], self.sqrt_1m_acp[t_arr]],
                          axis=1).astype(jnp.float32)       # (S, 2)

        # Per-step noise, stacked so the kernel indexes it by grid step.
        noise = jnp.stack(
            [jax.random.normal(jax.random.fold_in(self._noise_key, si),
                               (C, HW), dtype=jnp.float32)
             for si in range(num_steps)], axis=0)           # (S, C, HW)

        # Hoisted timestep-embedding projection, folded into a per-step bias.
        temb = jnp.stack([timestep_embedding(t, self.t_emb_dim)
                          for t in self.steps], axis=0)     # (S, Demb)
        bias_eff = (self.b_all + temb @ self.wt_all)[:, :, None]  # (S, Csum, 1)

        # Single fused pallas_call for all steps and all blocks.
        feats = fused_feature_steps(coefs, z_c_hw, noise, self.wT_all, bias_eff)
        # feats: (S, Csum, HW), channels already 0:-1:2-sliced per block.

        activations = []
        for si in range(num_steps):
            off = 0
            for cout_s in self.block_couts:
                feat_nchw = feats[si, off:off + cout_s, :].reshape(1, cout_s, H, W)
                activations.append(feat_nchw)
                off += cout_s
        return activations


if __name__ == "__main__":
    key = jax.random.PRNGKey(0)
    kz, kp = jax.random.split(key)

    # Small synthetic latent consistent with the DDPM forward (batch=1, 4 latent
    # channels, 16x16 spatial — i.e. the SD latent at a reduced resolution).
    z = jax.random.normal(kz, (1, 4, 16, 16), dtype=jnp.float32)

    extractor = FeatureExtractorDDPMPallas(
        blocks=[0, 1], steps=[10, 50], key=kp,
        latent_ch=4, spatial=16, t_emb_dim=128, block_channels=(32, 16),
    )

    acts = extractor.forward(z)
    for a in acts:
        jax.block_until_ready(a)

    # sanity: 2 steps x 2 blocks = 4 activations; channels halved by the stride-2 slice
    assert len(acts) == 4
    assert acts[0].shape == (1, 16, 16, 16)   # 32 channels -> 0:-1:2 -> 16
    assert acts[1].shape == (1, 8, 16, 16)    # 16 channels -> 0:-1:2 -> 8
    assert acts[2].shape == (1, 16, 16, 16)
    assert acts[3].shape == (1, 8, 16, 16)
    print("KERNEL_OK")
</pallas_src>

<mosaic_0001>
module attributes {stable_mosaic.version = 11 : i64} {
  func.func @_fused_step_kernel(%arg0: i32, %arg1: memref<2x2xf32, #tpu.memory_space<smem>>, %arg2: memref<4x256xf32, #tpu.memory_space<vmem>>, %arg3: memref<1x4x256xf32, #tpu.memory_space<vmem>>, %arg4: memref<24x4xf32, #tpu.memory_space<vmem>>, %arg5: memref<1x24x1xf32, #tpu.memory_space<vmem>>, %arg6: memref<1x24x256xf32, #tpu.memory_space<vmem>>) attributes {dimension_semantics = [#tpu.dimension_semantics<parallel>], iteration_bounds = array<i64: 2>, scalar_prefetch = 0 : i64, scratch_operands = 0 : i64, tpu.core_type = #tpu.core_type<tc>, window_params = [{transform_indices = @transform_0, window_bounds = array<i64: 2, 2>}, {pipeline_mode = #tpu.pipeline_mode<synchronous>, transform_indices = @transform_1, window_bounds = array<i64: 4, 256>}, {transform_indices = @transform_2, window_bounds = array<i64: 1, 4, 256>}, {pipeline_mode = #tpu.pipeline_mode<synchronous>, transform_indices = @transform_3, window_bounds = array<i64: 24, 4>}, {transform_indices = @transform_4, window_bounds = array<i64: 1, 24, 1>}, {transform_indices = @transform_5, window_bounds = array<i64: 1, 24, 256>}]} {
    %0 = arith.index_cast %arg0 : i32 to index
    %c0 = arith.constant 0 : index
    %1 = memref.load %arg1[%0, %c0] : memref<2x2xf32, #tpu.memory_space<smem>>
    %2 = arith.index_cast %arg0 : i32 to index
    %c1 = arith.constant 1 : index
    %3 = memref.load %arg1[%2, %c1] : memref<2x2xf32, #tpu.memory_space<smem>>
    %c0_0 = arith.constant 0 : index
    %c0_1 = arith.constant 0 : index
    %4 = vector.load %arg2[%c0_0, %c0_1] : memref<4x256xf32, #tpu.memory_space<vmem>>, vector<4x256xf32>
    %5 = vector.broadcast %1 : f32 to vector<4x256xf32>
    %6 = arith.mulf %5, %4 : vector<4x256xf32>
    %c0_2 = arith.constant 0 : index
    %c0_3 = arith.constant 0 : index
    %c0_4 = arith.constant 0 : index
    %7 = vector.load %arg3[%c0_2, %c0_3, %c0_4] : memref<1x4x256xf32, #tpu.memory_space<vmem>>, vector<1x4x256xf32>
    %8 = vector.shape_cast %7 : vector<1x4x256xf32> to vector<4x256xf32>
    %9 = vector.broadcast %3 : f32 to vector<4x256xf32>
    %10 = arith.mulf %9, %8 : vector<4x256xf32>
    %11 = arith.addf %6, %10 : vector<4x256xf32>
    %c0_5 = arith.constant 0 : index
    %c0_6 = arith.constant 0 : index
    %12 = vector.load %arg4[%c0_5, %c0_6] : memref<24x4xf32, #tpu.memory_space<vmem>>, vector<24x4xf32>
    %cst = arith.constant dense<0.000000e+00> : vector<24x256xf32>
    %13 = tpu.matmul %12, %11, %cst {dimension_numbers = #tpu.dot_dimension_numbers<[1], [0], [0], [1], [0, 0, 1, 1], [], []>} : vector<24x4xf32>, vector<4x256xf32>, vector<24x256xf32> -> vector<24x256xf32>
    %c0_7 = arith.constant 0 : index
    %c0_8 = arith.constant 0 : index
    %c0_9 = arith.constant 0 : index
    %14 = vector.load %arg5[%c0_7, %c0_8, %c0_9] : memref<1x24x1xf32, #tpu.memory_space<vmem>>, vector<1x24x1xf32>
    %15 = vector.shape_cast %14 : vector<1x24x1xf32> to vector<24x1xf32>
    %16 = vector.broadcast %15 : vector<24x1xf32> to vector<24x256xf32>
    %17 = arith.addf %13, %16 : vector<24x256xf32>
    %18 = arith.negf %17 : vector<24x256xf32>
    %19 = math.exp %18 : vector<24x256xf32>
    %cst_10 = arith.constant 1.000000e+00 : f32
    %20 = vector.broadcast %cst_10 : f32 to vector<24x256xf32>
    %21 = arith.addf %20, %19 : vector<24x256xf32>
    %22 = arith.divf %20, %21 : vector<24x256xf32>
    %23 = arith.mulf %17, %22 : vector<24x256xf32>
    %c0_11 = arith.constant 0 : index
    %c0_12 = arith.constant 0 : index
    %c0_13 = arith.constant 0 : index
    %24 = vector.load %arg6[%c0_11, %c0_12, %c0_13] : memref<1x24x256xf32, #tpu.memory_space<vmem>>, vector<1x24x256xf32>
    %25 = vector.shape_cast %24 : vector<1x24x256xf32> to vector<24x256xf32>
    %26 = vector.shape_cast %23 : vector<24x256xf32> to vector<1x24x256xf32>
    tpu.vector_store %arg6[%c0_11, %c0_12, %c0_13], %26 {strides = array<i32>} : memref<1x24x256xf32, #tpu.memory_space<vmem>>, vector<1x24x256xf32>,
    return
  }
  func.func @transform_0(%arg0: i32) -> (i32, i32) {
    %c0_i32 = arith.constant 0 : i32
    %c0_i32_0 = arith.constant 0 : i32
    %c0_i32_1 = arith.constant 0 : i32
    return %c0_i32, %c0_i32_0 : i32, i32
  }
  func.func @transform_1(%arg0: i32) -> (i32, i32) {
    %c0_i32 = arith.constant 0 : i32
    %c0_i32_0 = arith.constant 0 : i32
    %c0_i32_1 = arith.constant 0 : i32
    return %c0_i32, %c0_i32_0 : i32, i32
  }
  func.func @transform_2(%arg0: i32) -> (i32, i32, i32) {
    %c0_i32 = arith.constant 0 : i32
    %c0_i32_0 = arith.constant 0 : i32
    %c0_i32_1 = arith.constant 0 : i32
    return %arg0, %c0_i32, %c0_i32_0 : i32, i32, i32
  }
  func.func @transform_3(%arg0: i32) -> (i32, i32) {
    %c0_i32 = arith.constant 0 : i32
    %c0_i32_0 = arith.constant 0 : i32
    %c0_i32_1 = arith.constant 0 : i32
    return %c0_i32, %c0_i32_0 : i32, i32
  }
  func.func @transform_4(%arg0: i32) -> (i32, i32, i32) {
    %c0_i32 = arith.constant 0 : i32
    %c0_i32_0 = arith.constant 0 : i32
    %c0_i32_1 = arith.constant 0 : i32
    return %arg0, %c0_i32, %c0_i32_0 : i32, i32, i32
  }
  func.func @transform_5(%arg0: i32) -> (i32, i32, i32) {
    %c0_i32 = arith.constant 0 : i32
    %c0_i32_0 = arith.constant 0 : i32
    %c0_i32_1 = arith.constant 0 : i32
    return %arg0, %c0_i32, %c0_i32_0 : i32, i32, i32
  }
}

</mosaic_0001>

<bundles_post_ra>
// kernel: tpu_custom_call.1
= control target key start
LH: loop header
LB: loop body
LE: loop exit
PB: predicated region body
PF: predicated region fallthrough
CT: control target
= control target key end

     0   :  { %10 = vsyncpa [#allocation4], 0  ;;  %s903_s0 = inlined_call_operand.vmem [shape: f32[2,2], index: 0, kind: input, shape index: {}]   ;;  %s904_s1 = inlined_call_operand.vmem [shape: f32[4,256], index: 1, kind: input, shape index: {}]   ;;  %s905_s2 = inlined_call_operand.vmem [shape: f32[2,4,256], index: 2, kind: input, shape index: {}]   ;;  %s906_s3 = inlined_call_operand.vmem [shape: f32[24,4], index: 3, kind: input, shape index: {}]   ;;  %s907_s4 = inlined_call_operand.vmem [shape: f32[2,24,1], index: 4, kind: input, shape index: {}]   ;;  %s908_s5 = inlined_call_operand.hbm [shape: f32[2,24,256], index: 5, kind: output, shape index: {}]  }
   0x1   :  { %11 = vsyncpa [#allocation3], 0 }
   0x2   :  { %13 = vsyncpa [#allocation3 + $0x1], 0  ;;  %s766_s18 = smov 0   ;;  %s768_s19 = smov 0  }
   0x3   :  { %s770_s20 = smov 0   ;;  %s772_s21 = smov 0  }
   0x4 LB: > { %s787_s22 = sadd.s32 4294967295, %s728_s21   ;;  %s537_s23 = sadd.s32 4294967294, %s728_s21   ;;  %s728_s21 = sphi %s772_s21, %s915_s21   ;;  %s724_s20 = sphi %s770_s20, %s914_s20   ;;  %s720_s19 = sphi %s768_s19, %s913_s19   ;;  %s716_s18 = sphi %s766_s18, %s912_s18  }
   0x5   : > { %s791_s24 = sadd.s32 1, %s728_s21   ;;  %s141_s25 = sadd.s32 1, %s724_s20 }
   0x6   : > { %s138_s26 = ssub.s32 %s728_s21, %s791_s24  ;;  %p151_p0 = scmp.ne.s32.totalorder %s724_s20, %s720_s19 }
   0x7   : > { %p139_p1 = scmp.eq.s32.totalorder %s138_s26, 0  ;;  %p152_p2 = scmp.eq.s32.totalorder %s787_s22, 1 }
   0x8   : > { %p157_p3 = scmp.ne.s32.totalorder %s720_s19, %s716_s18  ;;  %p158_p4 = scmp.eq.s32.totalorder %s537_s23, 1 }
   0x9   : > { %s802_s27 = scalar_select %p139_p1, %s724_s20, %s141_s25  }
   0xa   : > { %p804_p5 = por %p152_p2, %p151_p0  ;;  %p808_p6 = por %p158_p4, %p157_p3 }
   0xb   : > { %p538_p7 = scmp.ge.s32.totalorder %s728_s21, 1  ;;  %p165_p8 = scmp.lt.s32.totalorder %s728_s21, 3 }
   0xc   : > { %p581_p9 = scmp.eq.s32.totalorder %s787_s22, 0  ;;  %s178_s8 = sshll.u32 %s903_s0, 4  ;;  %s179_s8 = int_to_ptr.vmem [resolvable:$true] %s178_s8 }
   0xd   : > { %p815_p10 = pnand %p538_p7, %p165_p8  ;;  %s647_s9 = scalar_lea.vmem %s179_s8, 32 }
   0xe   : > { %p648_p13 = scmp.ne.s32.totalorder %s179_s8, %s647_s9  ;;  %p655_p3 = scmp.lt.s32.totalorder %s179_s8, %s179_s8 }
   0xf   : > { %p573_p11 = pneg %p815_p10  ;;  %p656_p4 = scmp.lt.s32.totalorder %s647_s9, %s647_s9 }
  0x11   : > { %p574_p12 = pnand %p581_p9, %p573_p11  ;;  %p657_p7 = por %p656_p4, %p655_p3 }
  0x13   : > { %p649_p0 = pneg %p574_p12 }
  0x15   : > { %p650_p1 = pnand %p649_p0, %p648_p13 }
  0x17   : > { %p651_p2 = pneg %p650_p1 }
  0x19   : > { %p658_p8 = pnand %p657_p7, %p651_p2 }
  0x1b   : > { %661 = shalt.err (!%p658_p8)
}
  0x1c   : > { %s730_s10 = smov [#allocation2]   ;;  %213 = sbr.rel (%p815_p10) target bundleno = 318 (0x13e), region = 40 }
  0x1d   : > { %576 = dma.vmem_to_smem (!%p574_p12), %s179_s8, 32, %s730_s10, [#allocation4]  }
  0x23   : > { %707 = dma.done.wait (%p581_p9), [#allocation4], 32  }
  0x24   : > { %709 = vsyncadd (%p581_p9), [#allocation4], 4294967264 }
  0x25   : > { %219 = sfence }
  0x26   : > { %p247_p11 = scmp.lt.s32.totalorder %s787_s22, 1  ;;  %s546_s11 = sshll.u32 %s787_s22, 7  ;;  %v731_v0 = vmov 0.0   ;;  %v732_v1 = vmov 0   ;;  %v261_v2 = vld [vmem:[%s904_s1] sm:$0xff]  ;;  %vm301_vm0 = vcmask 1043456  }
  0x27   : > { %s258_s12 = sld [smem:[#allocation2 + %s546_s11]]  ;;  %s259_s13 = sadd.s32 1, %s546_s11  ;;  %370 = vmatprep.mubr.f32.mxu0 %v731_v0  ;;  %376 = vmatprep.mubr.f32.mxu1 %v731_v0  ;;  %v268_v13 = vld [vmem:[%s906_s3] sm:$0xff]  ;;  %vm291_vm1 = vcmask 31744   ;;  %v269_v14 = vld [vmem:[%s906_s3 + $0x8] sm:$0xff]  ;;  %v270_v15 = vld [vmem:[%s906_s3 + $0x10] sm:$0xff] }
  0x28   : > { %s248_s14 = scalar_select %p247_p11, %s787_s22, 1  ;;  %621 = vset.pattern.permute.xlu0 %v732_v1  ;;  %622 = vset.pattern.permute.xlu1 %v732_v1 }
  0x29   : > { %s260_s15 = sld [smem:[#allocation2 + %s259_s13]] }
  0x2a   : > { %s561_s16 = sshll.u32 %s248_s14, 3  ;;  %s565_s17 = smul.u32 24, %s248_s14 }
  0x2b   : > { %s251_s26 = scalar_lea.vmem %s905_s2, %s561_s16  ;;  %s244_s16 = sand.u32 1, %s720_s19  }
  0x2c   : > { %s256_s9 = scalar_lea.vmem %s907_s4, %s565_s17  ;;  %v264_v4 = vld [vmem:[%s251_s26] sm:$0xff]  ;;  %s564_s17 = smul.u32 48, %s244_s16 }
  0x2d   : > { %v262_v3 = vstv %s258_s12  ;;  %v271_v5 = vld [vmem:[%s256_s9] sm:$0xff]  ;;  %v273_v6 = vld [vmem:[%s256_s9 + $0x10] sm:$0xff]  ;;  %v272_v9 = vld [vmem:[%s256_s9 + $0x8] sm:$0xff]  ;;  %s566_s26 = smul.u32 768, %s787_s22  ;;  %s862_s7 = scalar_lea.sflag [#allocation3], %s244_s16 }
  0x2e   : > { %v263_v7 = vmul.f32 %v262_v3, %v261_v2  ;;  %276 = vperm.xlu0 %621, %v271_v5   ;;  %286 = vperm.xlu1 %622, %v273_v6   ;;  %s246_s23 = scalar_lea.vmem [#allocation5], %s564_s17  ;;  %s733_s9 = smov [#allocation5]  }
  0x2f   : > { %v265_v8 = vstv %s260_s15  ;;  %s451_s25 = sshll.u32 %s246_s23, 4  ;;  %s860_s22 = scalar_lea.hbm %s908_s5, %s566_s26  ;;  %s855_s25 = int_to_ptr.vmem [resolvable:$true] %s451_s25 }
  0x30   : > { %v266_v10 = vmul.f32 %v265_v8, %v264_v4  ;;  %s662_s8 = scalar_lea.vmem %s855_s25, 768  ;;  %s666_s10 = sshll.u32 %s733_s9, 4  ;;  %s667_s10 = int_to_ptr.vmem [resolvable:$false] %s666_s10 }
  0x31   : > { %p663_p9 = scmp.ne.s32.totalorder %s855_s25, %s662_s8  ;;  %s668_s11 = scalar_lea.vmem %s667_s10, 1536 }
  0x32   : > { %v267_v11 = vadd.f32 %v266_v10, %v263_v7  ;;  %281 = vperm.xlu0 %621, %v272_v9   ;;  %p669_p13 = scmp.lt.s32.totalorder %s855_s25, %s667_s10  ;;  %p670_p0 = scmp.lt.s32.totalorder %s668_s11, %s662_s8 }
  0x33   : > { %p664_p10 = pnand %p663_p9, %p804_p5 }
  0x34   : > { %v290_v12 = vcombine.high %v267_v11, %v267_v11  ;;  %p671_p1 = por %p670_p0, %p669_p13 }
  0x35   : > { %p665_p12 = pneg %p664_p10 }
  0x36   : > { %547 = vmatprep.subr.msk.mxu0 %vm301_vm0, %v290_v12  ;;  %562 = vmatprep.subr.msk.mxu1 %vm301_vm0, %v290_v12 }
  0x37   : > { %548 = vmatpush1.msk.msra.mxu0 %vm301_vm0, %v267_v11  ;;  %563 = vmatpush1.msk.msra.mxu1 %vm301_vm0, %v267_v11  ;;  %p672_p2 = pnand %p671_p1, %p665_p12 }
  0x38   : > { %549 = vmatmul.mubr.msk.f32.vlgmr.msra.gmra.mrb[0].mxu0 %vm291_vm1, %v268_v13  ;;  %550 = vmatmul.mubr.msk.f32.vlgmr.msra.gmra.mrb[0].mxu1 %vm291_vm1, %v269_v14 }
  0x39   : > { %382 = vmatprep.mubr.f32.mxu1 %v731_v0 }
  0x3c   : > { %551 = vmatmul.mubr.msk.f32.gmra.mrb[2].mxu1 %vm291_vm1, %v270_v15 }
  0xad   : > { %v277_v16 = vpop.permute.xlu0 %276  ;;  %v287_v26 = vpop.permute.xlu1 %286 }
  0xb1   : > { %v282_v17 = vpop.permute.xlu0 %281 }
 0x10b   : > { %v372_v18 = vpop.f32.mrb[0].mxu0  ;;  %v378_v19 = vpop.f32.mrb[0].mxu1 }
 0x10c   : > { %v373_v20 = vadd.f32 %v372_v18, %v277_v16  ;;  %v379_v21 = vadd.f32 %v378_v19, %v282_v17  ;;  %v374_v22 = vpop.f32.mrb[1].mxu0  ;;  %v380_v23 = vpop.f32.mrb[1].mxu1 }
 0x10d   : > { %v375_v24 = vadd.f32 %v374_v22, %v277_v16  ;;  %v381_v25 = vadd.f32 %v380_v23, %v282_v17 }
 0x10e   : > { %v552_v27 = vmul.f32 -1.442695, %v373_v20  ;;  %v554_v28 = vmul.f32 -1.442695, %v379_v21 }
 0x10f   : > { %v553_v29 = vmul.f32 -1.442695, %v375_v24  ;;  %v555_v30 = vmul.f32 -1.442695, %v381_v25  ;;  %v384_v31 = vpop.f32.mrb[2].mxu1 }
 0x110   : > { %623 = vpow2.f32 %v552_v27  ;;  %v385_v32 = vadd.f32 %v384_v31, %v287_v26  ;;  %v386_v33 = vpop.f32.mrb[3].mxu1 }
 0x111   : > { %625 = vpow2.f32 %v554_v28  ;;  %v387_v34 = vadd.f32 %v386_v33, %v287_v26 }
 0x112   : > { %627 = vpow2.f32 %v553_v29  ;;  %v556_v35 = vmul.f32 -1.442695, %v385_v32 }
 0x113   : > { %629 = vpow2.f32 %v555_v30  ;;  %v557_v36 = vmul.f32 -1.442695, %v387_v34 }
 0x114   : > { %631 = vpow2.f32 %v556_v35 }
 0x115   : > { %633 = vpow2.f32 %v557_v36 }
 0x11a   : > { %v624_v37 = vpop.eup %623 }
 0x11b   : > { %v626_v38 = vpop.eup %625  ;;  %v407_v39 = vadd.f32 1.0, %v624_v37 }
 0x11c   : > { %v628_v40 = vpop.eup %627  ;;  %v409_v41 = vadd.f32 1.0, %v626_v38 }
 0x11d   : > { %v630_v42 = vpop.eup %629  ;;  %635 = vrcp.f32 %v407_v39  ;;  %v408_v43 = vadd.f32 1.0, %v628_v40 }
 0x11e   : > { %v632_v44 = vpop.eup %631  ;;  %637 = vrcp.f32 %v409_v41  ;;  %v410_v45 = vadd.f32 1.0, %v630_v42 }
 0x11f   : > { %v634_v46 = vpop.eup %633  ;;  %639 = vrcp.f32 %v408_v43  ;;  %v411_v47 = vadd.f32 1.0, %v632_v44 }
 0x120   : > { %641 = vrcp.f32 %v410_v45  ;;  %v412_v48 = vadd.f32 1.0, %v634_v46 }
 0x121   : > { %643 = vrcp.f32 %v411_v47 }
 0x122   : > { %645 = vrcp.f32 %v412_v48 }
 0x127   : > { %v636_v49 = vpop.eup %635 }
 0x128   : > { %v638_v50 = vpop.eup %637  ;;  %v425_v51 = vmul.f32 %v636_v49, %v373_v20 }
 0x129   : > { %v640_v52 = vpop.eup %639  ;;  %v427_v53 = vmul.f32 %v638_v50, %v379_v21 }
 0x12a   : > { %v642_v54 = vpop.eup %641  ;;  %431 = vst [vmem:[%s246_s23] sm:$0xff] %v425_v51  ;;  %v426_v55 = vmul.f32 %v640_v52, %v375_v24 }
 0x12b   : > { %v644_v56 = vpop.eup %643  ;;  %433 = vst [vmem:[%s246_s23 + $0x10] sm:$0xff] %v427_v53  ;;  %v428_v57 = vmul.f32 %v642_v54, %v381_v25 }
 0x12c   : > { %v646_v58 = vpop.eup %645  ;;  %432 = vst [vmem:[%s246_s23 + $0x8] sm:$0xff] %v426_v55  ;;  %v429_v59 = vmul.f32 %v644_v56, %v385_v32 }
 0x12d   : > { %434 = vst [vmem:[%s246_s23 + $0x18] sm:$0xff] %v428_v57  ;;  %v430_v60 = vmul.f32 %v646_v58, %v387_v34 }
 0x12e   : > { %435 = vst [vmem:[%s246_s23 + $0x20] sm:$0xff] %v429_v59 }
 0x12f   : > { %436 = vst [vmem:[%s246_s23 + $0x28] sm:$0xff] %v430_v60 }
 0x130   : > { %675 = shalt.err (!%p672_p2)
}
 0x131   : > { %s676_s13 = scalar_lea.hbm %s860_s22, 768  ;;  %s680_s15 = scalar_lea.hbm %s908_s5, 1536 }
 0x132   : > { %p677_p3 = scmp.ne.s32.totalorder %s860_s22, %s676_s13  ;;  %p681_p8 = scmp.lt.u32.totalorder %s860_s22, %s908_s5 }
 0x133   : > { %p682_p11 = scmp.lt.u32.totalorder %s680_s15, %s676_s13  ;;  %p684_p10 = scmp.lt.u32.totalorder %s676_s13, %s860_s22 }
 0x134   : > { %p678_p4 = pnand %p677_p3, %p804_p5 }
 0x135   : > { %p683_p9 = por %p682_p11, %p681_p8 }
 0x136   : > { %p679_p7 = pneg %p678_p4 }
 0x137   : > { %p685_p12 = por %p684_p10, %p683_p9 }
 0x139   : > { %p686_p13 = pnand %p685_p12, %p679_p7 }
 0x13b   : > { %689 = shalt.err (!%p686_p13)
}
 0x13c   : > { %s734_s23 = smov 256   ;;  %s735_s26 = smov 16  }
 0x13d   : > { %571 = dma.vmem_to_hbm [thread:$0]  (%p804_p5), %s855_s25, 768, %s860_s22, %s862_s7, %s734_s23, %s734_s23, %s735_s26  }
 0x13e PF: > { %p583_p0 = scmp.ge.s32.totalorder %s728_s21, 2  ;;  %s466_s30 = sand.u32 1, %s716_s18  }
 0x13f   : > { %s467_s6 = scalar_lea.sflag [#allocation3], %s466_s30 }
 0x140   : > { %p578_p1 = pnand %p583_p0, %p808_p6 }
 0x142   : > { %711 = dma.done.wait (!%p578_p1), %s467_s6, 768  }
 0x143   : > { %713 = vsyncadd (!%p578_p1), %s467_s6, 4294966528  ;;  %p16_p2 = scmp.ge.s32.totalorder %s791_s24, 4   ;;  %s912_s18 = smov %s720_s19 }
 0x144   : > { %s913_s19 = smov %s724_s20  ;;  %s914_s20 = smov %s802_s27 }
 0x145   : > { %s915_s21 = smov %s791_s24  ;;  %18 = sbr.rel (!%p16_p2) target bundleno = 4 (0x4), region = 83 }
 0x14c   :  { %472 = vsyncpa [#allocation3], 1 }
 0x14d   :  { %474 = vsyncpa [#allocation3 + $0x1], 1 }
 0x14e   :  { %475 = vsyncpa [#allocation4], 1 }
 0x14f   :  { %477 = vsyncpa [#allocation4 + $0x1], 1 }

</bundles_post_ra>
